<compile_context>
chip_gen: v7x
topology: tpu7x:2x2x1
jax: 0.10.0
libtpu: 0.0.40
codegen_flags: <defaults>
</compile_context>

<pallas_src>
import jax
import jax.numpy as jnp
import numpy as np
from jax.experimental import pallas as pl
from jax.experimental.pallas import tpu as pltpu

HIDDEN_SIZE = 64
KAPPA = 8
INPUT_SIZE = (KAPPA + 1) * 2 + 1   # 19
OUTPUT_SIZE = 9
OUT_PAD = 128                      # lane-dense padded output width


def dqn_kernel(x_ref, w1_ref, b1_ref, w2_ref, b2_ref, w3_ref, b3_ref, o_ref):
    # x_ref: (TB, 19) bf16, weights bf16, biases f32, o_ref: (TB, 128) f32.
    # Layer 1: Linear + ReLU (MXU matmul w/ f32 accumulation, VPU add/max)
    h1 = jnp.dot(x_ref[...], w1_ref[...], preferred_element_type=jnp.float32)
    h1 = jnp.maximum(h1 + b1_ref[...], 0.0)
    # Layer 2: Linear + ReLU
    h2 = jnp.dot(h1.astype(jnp.bfloat16), w2_ref[...],
                 preferred_element_type=jnp.float32)
    h2 = jnp.maximum(h2 + b2_ref[...], 0.0)
    # Layer 3: Linear (no activation); output lanes padded to 128 (dense store)
    out = jnp.dot(h2.astype(jnp.bfloat16), w3_ref[...],
                  preferred_element_type=jnp.float32)
    o_ref[...] = (out + b3_ref[...]).astype(o_ref.dtype)


def dqn_forward(x, params, *, tb=512):
    """x: (B, 19) f32. Returns (B, 9) f32. tb: batch tile (multiple of 8)."""
    w1, b1, w2, b2, w3, b3 = params
    batch = x.shape[0]

    # Pad batch to a multiple of tb so every grid step works on a full tile.
    b_pad = max(tb, ((batch + tb - 1) // tb) * tb)
    x_p = jnp.zeros((b_pad, INPUT_SIZE), jnp.bfloat16).at[:batch].set(
        x.astype(jnp.bfloat16))

    # bf16 weights for the MXU; biases stay f32 (bias-add / ReLU in f32).
    w1b = w1.astype(jnp.bfloat16)
    w2b = w2.astype(jnp.bfloat16)
    # Pad last layer 9 -> 128 output lanes for an unmasked, lane-dense store.
    w3b = jnp.zeros((HIDDEN_SIZE, OUT_PAD), jnp.bfloat16)
    w3b = w3b.at[:, :OUTPUT_SIZE].set(w3.astype(jnp.bfloat16))
    b3p = jnp.zeros((1, OUT_PAD), jnp.float32).at[:, :OUTPUT_SIZE].set(b3)

    # Weights/biases: constant block index -> resident in VMEM across the grid.
    resident = lambda arr: pl.BlockSpec(arr.shape, lambda i: (0,) * arr.ndim)

    out = pl.pallas_call(
        dqn_kernel,
        out_shape=jax.ShapeDtypeStruct((b_pad, OUT_PAD), jnp.float32),
        grid=(b_pad // tb,),
        in_specs=[
            pl.BlockSpec((tb, INPUT_SIZE), lambda i: (i, 0)),   # stream x tiles
            resident(w1b), resident(b1),
            resident(w2b), resident(b2),
            resident(w3b), resident(b3p),
        ],
        out_specs=pl.BlockSpec((tb, OUT_PAD), lambda i: (i, 0)),
        compiler_params=pltpu.CompilerParams(
            dimension_semantics=("parallel",)),   # shard batch across TCs (v7x)
    )(x_p, w1b, b1, w2b, b2, w3b, b3p)

    return out[:batch, :OUTPUT_SIZE]


def init_params(key):
    """Deterministic init mimicking PyTorch nn.Linear default
    (uniform(-1/sqrt(fan_in), 1/sqrt(fan_in)))."""
    def linear(key, fan_in, fan_out):
        kw, kb = jax.random.split(key)
        bound = 1.0 / np.sqrt(fan_in)
        # stored as (in, out) so kernel does x @ W
        w = jax.random.uniform(kw, (fan_in, fan_out), jnp.float32, -bound, bound)
        b = jax.random.uniform(kb, (1, fan_out), jnp.float32, -bound, bound)
        return w, b

    k1, k2, k3 = jax.random.split(key, 3)
    w1, b1 = linear(k1, INPUT_SIZE, HIDDEN_SIZE)
    w2, b2 = linear(k2, HIDDEN_SIZE, HIDDEN_SIZE)
    w3, b3 = linear(k3, HIDDEN_SIZE, OUTPUT_SIZE)
    return w1, b1, w2, b2, w3, b3


def reference_forward(x, params):
    """Pure-f32 reference matching the PyTorch module exactly."""
    w1, b1, w2, b2, w3, b3 = params
    h1 = jnp.maximum(x @ w1 + b1, 0.0)
    h2 = jnp.maximum(h1 @ w2 + b2, 0.0)
    return h2 @ w3 + b3


if __name__ == "__main__":
    key = jax.random.PRNGKey(0)
    k_params, k_x = jax.random.split(key)

    params = init_params(k_params)
    # Small test batch that still exercises multiple grid steps + batch padding
    # (300 rows, tb=128 -> padded to 384 rows, grid of 3 tiles).
    batch = 300
    x = jax.random.normal(k_x, (batch, INPUT_SIZE), jnp.float32)

    out = dqn_forward(x, params, tb=128)
    out = jax.block_until_ready(out)

    # Kernel uses bf16 matmul inputs (f32 accumulation), so compare against the
    # f32 reference with a loose tolerance.
    ref = reference_forward(x, params)
    np.testing.assert_allclose(np.asarray(out), np.asarray(ref),
                               rtol=2e-2, atol=2e-2)

    assert out.shape == (batch, OUTPUT_SIZE)
    print("KERNEL_OK")
</pallas_src>

<mosaic_0001>
module attributes {stable_mosaic.version = 11 : i64} {
  func.func @dqn_kernel(%arg0: i32, %arg1: memref<128x19xbf16, #tpu.memory_space<vmem>>, %arg2: memref<19x64xbf16, #tpu.memory_space<vmem>>, %arg3: memref<1x64xf32, #tpu.memory_space<vmem>>, %arg4: memref<64x64xbf16, #tpu.memory_space<vmem>>, %arg5: memref<1x64xf32, #tpu.memory_space<vmem>>, %arg6: memref<64x128xbf16, #tpu.memory_space<vmem>>, %arg7: memref<1x128xf32, #tpu.memory_space<vmem>>, %arg8: memref<128x128xf32, #tpu.memory_space<vmem>>) attributes {dimension_semantics = [#tpu.dimension_semantics<parallel>], iteration_bounds = array<i64: 3>, scalar_prefetch = 0 : i64, scratch_operands = 0 : i64, tpu.core_type = #tpu.core_type<tc>, window_params = [{transform_indices = @transform_0, window_bounds = array<i64: 128, 19>}, {pipeline_mode = #tpu.pipeline_mode<synchronous>, transform_indices = @transform_1, window_bounds = array<i64: 19, 64>}, {pipeline_mode = #tpu.pipeline_mode<synchronous>, transform_indices = @transform_2, window_bounds = array<i64: 1, 64>}, {pipeline_mode = #tpu.pipeline_mode<synchronous>, transform_indices = @transform_3, window_bounds = array<i64: 64, 64>}, {pipeline_mode = #tpu.pipeline_mode<synchronous>, transform_indices = @transform_4, window_bounds = array<i64: 1, 64>}, {pipeline_mode = #tpu.pipeline_mode<synchronous>, transform_indices = @transform_5, window_bounds = array<i64: 64, 128>}, {pipeline_mode = #tpu.pipeline_mode<synchronous>, transform_indices = @transform_6, window_bounds = array<i64: 1, 128>}, {transform_indices = @transform_7, window_bounds = array<i64: 128, 128>}]} {
    %c0 = arith.constant 0 : index
    %c0_0 = arith.constant 0 : index
    %0 = vector.load %arg1[%c0, %c0_0] : memref<128x19xbf16, #tpu.memory_space<vmem>>, vector<128x19xbf16>
    %c0_1 = arith.constant 0 : index
    %c0_2 = arith.constant 0 : index
    %1 = vector.load %arg2[%c0_1, %c0_2] : memref<19x64xbf16, #tpu.memory_space<vmem>>, vector<19x64xbf16>
    %cst = arith.constant dense<0.000000e+00> : vector<128x64xf32>
    %2 = tpu.matmul %0, %1, %cst {dimension_numbers = #tpu.dot_dimension_numbers<[1], [0], [0], [1], [0, 0, 1, 1], [], []>} : vector<128x19xbf16>, vector<19x64xbf16>, vector<128x64xf32> -> vector<128x64xf32>
    %c0_3 = arith.constant 0 : index
    %c0_4 = arith.constant 0 : index
    %3 = vector.load %arg3[%c0_3, %c0_4] : memref<1x64xf32, #tpu.memory_space<vmem>>, vector<1x64xf32>
    %4 = vector.broadcast %3 : vector<1x64xf32> to vector<128x64xf32>
    %5 = arith.addf %2, %4 : vector<128x64xf32>
    %cst_5 = arith.constant 0.000000e+00 : f32
    %6 = vector.broadcast %cst_5 : f32 to vector<128x64xf32>
    %7 = arith.maximumf %5, %6 : vector<128x64xf32>
    %8 = arith.truncf %7 : vector<128x64xf32> to vector<128x64xbf16>
    %c0_6 = arith.constant 0 : index
    %c0_7 = arith.constant 0 : index
    %9 = vector.load %arg4[%c0_6, %c0_7] : memref<64x64xbf16, #tpu.memory_space<vmem>>, vector<64x64xbf16>
    %cst_8 = arith.constant dense<0.000000e+00> : vector<128x64xf32>
    %10 = tpu.matmul %8, %9, %cst_8 {dimension_numbers = #tpu.dot_dimension_numbers<[1], [0], [0], [1], [0, 0, 1, 1], [], []>} : vector<128x64xbf16>, vector<64x64xbf16>, vector<128x64xf32> -> vector<128x64xf32>
    %c0_9 = arith.constant 0 : index
    %c0_10 = arith.constant 0 : index
    %11 = vector.load %arg5[%c0_9, %c0_10] : memref<1x64xf32, #tpu.memory_space<vmem>>, vector<1x64xf32>
    %12 = vector.broadcast %11 : vector<1x64xf32> to vector<128x64xf32>
    %13 = arith.addf %10, %12 : vector<128x64xf32>
    %cst_11 = arith.constant 0.000000e+00 : f32
    %14 = vector.broadcast %cst_11 : f32 to vector<128x64xf32>
    %15 = arith.maximumf %13, %14 : vector<128x64xf32>
    %16 = arith.truncf %15 : vector<128x64xf32> to vector<128x64xbf16>
    %c0_12 = arith.constant 0 : index
    %c0_13 = arith.constant 0 : index
    %17 = vector.load %arg6[%c0_12, %c0_13] : memref<64x128xbf16, #tpu.memory_space<vmem>>, vector<64x128xbf16>
    %cst_14 = arith.constant dense<0.000000e+00> : vector<128x128xf32>
    %18 = tpu.matmul %16, %17, %cst_14 {dimension_numbers = #tpu.dot_dimension_numbers<[1], [0], [0], [1], [0, 0, 1, 1], [], []>} : vector<128x64xbf16>, vector<64x128xbf16>, vector<128x128xf32> -> vector<128x128xf32>
    %c0_15 = arith.constant 0 : index
    %c0_16 = arith.constant 0 : index
    %19 = vector.load %arg7[%c0_15, %c0_16] : memref<1x128xf32, #tpu.memory_space<vmem>>, vector<1x128xf32>
    %20 = vector.broadcast %19 : vector<1x128xf32> to vector<128x128xf32>
    %21 = arith.addf %18, %20 : vector<128x128xf32>
    %c0_17 = arith.constant 0 : index
    %c0_18 = arith.constant 0 : index
    %22 = vector.load %arg8[%c0_17, %c0_18] : memref<128x128xf32, #tpu.memory_space<vmem>>, vector<128x128xf32>
    tpu.vector_store %arg8[%c0_17, %c0_18], %21 {strides = array<i32>} : memref<128x128xf32, #tpu.memory_space<vmem>>, vector<128x128xf32>,
    return
  }
  func.func @transform_0(%arg0: i32) -> (i32, i32) {
    %c0_i32 = arith.constant 0 : i32
    %c0_i32_0 = arith.constant 0 : i32
    return %arg0, %c0_i32 : i32, i32
  }
  func.func @transform_1(%arg0: i32) -> (i32, i32) {
    %c0_i32 = arith.constant 0 : i32
    %c0_i32_0 = arith.constant 0 : i32
    %c0_i32_1 = arith.constant 0 : i32
    return %c0_i32, %c0_i32_0 : i32, i32
  }
  func.func @transform_2(%arg0: i32) -> (i32, i32) {
    %c0_i32 = arith.constant 0 : i32
    %c0_i32_0 = arith.constant 0 : i32
    %c0_i32_1 = arith.constant 0 : i32
    return %c0_i32, %c0_i32_0 : i32, i32
  }
  func.func @transform_3(%arg0: i32) -> (i32, i32) {
    %c0_i32 = arith.constant 0 : i32
    %c0_i32_0 = arith.constant 0 : i32
    %c0_i32_1 = arith.constant 0 : i32
    return %c0_i32, %c0_i32_0 : i32, i32
  }
  func.func @transform_4(%arg0: i32) -> (i32, i32) {
    %c0_i32 = arith.constant 0 : i32
    %c0_i32_0 = arith.constant 0 : i32
    %c0_i32_1 = arith.constant 0 : i32
    return %c0_i32, %c0_i32_0 : i32, i32
  }
  func.func @transform_5(%arg0: i32) -> (i32, i32) {
    %c0_i32 = arith.constant 0 : i32
    %c0_i32_0 = arith.constant 0 : i32
    %c0_i32_1 = arith.constant 0 : i32
    return %c0_i32, %c0_i32_0 : i32, i32
  }
  func.func @transform_6(%arg0: i32) -> (i32, i32) {
    %c0_i32 = arith.constant 0 : i32
    %c0_i32_0 = arith.constant 0 : i32
    %c0_i32_1 = arith.constant 0 : i32
    return %c0_i32, %c0_i32_0 : i32, i32
  }
  func.func @transform_7(%arg0: i32) -> (i32, i32) {
    %c0_i32 = arith.constant 0 : i32
    %c0_i32_0 = arith.constant 0 : i32
    return %arg0, %c0_i32 : i32, i32
  }
}

</mosaic_0001>

<bundles_post_ra>
// kernel: tpu_custom_call.1
= control target key start
LH: loop header
LB: loop body
LE: loop exit
PB: predicated region body
PF: predicated region fallthrough
CT: control target
= control target key end

     0   :  { %12 = vsyncpa [#allocation3], 0  ;;  %s1466_s0 = inlined_call_operand.vmem [shape: bf16[384,19], index: 0, kind: input, shape index: {}]   ;;  %s1467_s1 = inlined_call_operand.vmem [shape: bf16[19,64], index: 1, kind: input, shape index: {}]   ;;  %s1468_s2 = inlined_call_operand.vmem [shape: f32[1,64], index: 2, kind: input, shape index: {}]   ;;  %s1469_s3 = inlined_call_operand.vmem [shape: bf16[64,64], index: 3, kind: input, shape index: {}]   ;;  %s1470_s4 = inlined_call_operand.vmem [shape: f32[1,64], index: 4, kind: input, shape index: {}]   ;;  %s1471_s5 = inlined_call_operand.vmem [shape: bf16[64,128], index: 5, kind: input, shape index: {}]   ;;  %s1472_s6 = inlined_call_operand.vmem [shape: f32[1,128], index: 6, kind: input, shape index: {}]   ;;  %s1473_s7 = inlined_call_operand.hbm [shape: f32[384,128], index: 7, kind: output, shape index: {}]  }
   0x1   :  { %14 = vsyncpa [#allocation3 + $0x1], 0  ;;  %s1278_s24 = smov 0   ;;  %s1280_s25 = smov 0  }
   0x2   :  { %s1282_s26 = smov 0   ;;  %s1284_s27 = smov 0  }
   0x3 LB: > { %s1299_s28 = sadd.s32 4294967295, %s1232_s27   ;;  %s946_s29 = sadd.s32 4294967294, %s1232_s27   ;;  %s1232_s27 = sphi %s1284_s27, %s1479_s27   ;;  %s1228_s26 = sphi %s1282_s26, %s1478_s26   ;;  %s1224_s25 = sphi %s1280_s25, %s1477_s25   ;;  %s1220_s24 = sphi %s1278_s24, %s1476_s24  }
   0x4   : > { %s1303_s30 = sadd.s32 1, %s1232_s27   ;;  %s179_s8 = sadd.s32 1, %s1228_s26 }
   0x5   : > { %s176_s9 = ssub.s32 %s1232_s27, %s1303_s30  ;;  %p189_p0 = scmp.ne.s32.totalorder %s1228_s26, %s1224_s25 }
   0x6   : > { %p177_p1 = scmp.eq.s32.totalorder %s176_s9, 0  ;;  %p190_p2 = scmp.eq.s32.totalorder %s1299_s28, 2 }
   0x7   : > { %p195_p3 = scmp.ne.s32.totalorder %s1224_s25, %s1220_s24  ;;  %p196_p4 = scmp.eq.s32.totalorder %s946_s29, 2 }
   0x8   : > { %s1314_s10 = scalar_select %p177_p1, %s1228_s26, %s179_s8  }
   0x9   : > { %p1316_p5 = por %p190_p2, %p189_p0  ;;  %p1320_p6 = por %p196_p4, %p195_p3 }
   0xa   : > { %p949_p7 = scmp.ge.s32.totalorder %s1232_s27, 1  ;;  %p241_p8 = scmp.lt.s32.totalorder %s1232_s27, 4 }
   0xc   : > { %p242_p9 = pnand %p949_p7, %p241_p8 }
   0xd   : > { %v1152_v0 = vld [vmem:[%s1467_s1] sm:$0xff] (!%p242_p9)   ;;  %vm381_vm0 = vcmask (!%p242_p9), 1040384   ;;  %v1153_v1 = vld [vmem:[%s1467_s1 + $0x8] ss:$0 sps:$4 sm:$0x33] (!%p242_p9)   ;;  %vm382_vm1 = vcmask (!%p242_p9), 1041408  }
   0xe   : > { %245 = sbr.rel (%p242_p9) target bundleno = 726 (0x2d6), region = 48  ;;  %1038 = vmatprep.subr.bf16.mxu0 (!%p242_p9), %v1152_v0  ;;  %s951_s17 = sshll.u32 (!%p242_p9), %s1299_s28, 4  ;;  %1106 = vmatprep.subr.bf16.mxu1 (!%p242_p9), %v1152_v0  ;;  %v1234_v2 = vmov (!%p242_p9), 65535   ;;  %v1162_v6 = vld [vmem:[%s1469_s3] sm:$0xff] (!%p242_p9)   ;;  %vm356_vm2 = vcmask (!%p242_p9), 154624   ;;  %v1163_v10 = vld [vmem:[%s1469_s3 + $0x8] sm:$0xff] (!%p242_p9)  }
   0xf   : > { %1039 = vmatpush3.bf16.msra.mxu0 (!%p242_p9), %v1152_v0  ;;  %v383_v3 = vsel (!%p242_p9), %vm381_vm0, 4294967295, %v1234_v2  ;;  %p274_p10 = scmp.lt.s32.totalorder (!%p242_p9), %s951_s17, 47  ;;  %1108 = vmatpush3.bf16.msra.mxu1 (!%p242_p9), %v1152_v0  ;;  %v1164_v16 = vld [vmem:[%s1469_s3 + $0x10] sm:$0xff] (!%p242_p9)   ;;  %v1165_v17 = vld [vmem:[%s1469_s3 + $0x18] sm:$0xff] (!%p242_p9)   ;;  %v1166_v18 = vld [vmem:[%s1471_s5] sm:$0xff] (!%p242_p9)   ;;  %vm548_vm3 = vcmask (!%p242_p9), 523264  }
  0x10   : > { %v384_v4 = vsel (!%p242_p9), %vm382_vm1, %v383_v3, 0  ;;  %v1167_v19 = vld [vmem:[%s1471_s5 + $0x8] sm:$0xff] (!%p242_p9)   ;;  %v953_v20 = vld [vmem:[%s1468_s2] ss:$0 sm:$0xff] (!%p242_p9)  ;;  %s270_s14 = sand.u32 (!%p242_p9), 1, %s1224_s25   ;;  %s1003_s19 = sshll.u32 (!%p242_p9), %s1299_s28, 11 }
  0x11   : > { %v386_v5 = vand.u32 (!%p242_p9), %v1153_v1, %v384_v4  ;;  %s950_s15 = sshll.u32 (!%p242_p9), %s270_s14, 7  ;;  %s1425_s28 = scalar_lea.sflag (!%p242_p9), [#allocation3], %s270_s14 }
  0x12   : > { %s1396_s18 = scalar_lea.vmem (!%p242_p9), [#allocation2], %s950_s15  ;;  %s1235_s8 = smov (!%p242_p9), [#allocation2]  }
  0x13   : > { %1040 = vmatprep.subr.bf16.mxu0 (!%p242_p9), %v386_v5  ;;  %1107 = vmatprep.subr.bf16.mxu1 (!%p242_p9), %v386_v5  ;;  %s1174_s9 = sshll.u32 (!%p242_p9), %s1235_s8, 4  ;;  %s1175_s9 = int_to_ptr.vmem [resolvable:$false] %s1174_s9 }
  0x14   : > { %1041 = vmatpush3.bf16.msra.mxu0 (!%p242_p9), %v386_v5  ;;  %1109 = vmatpush3.bf16.msra.mxu1 (!%p242_p9), %v386_v5  ;;  %s1176_s13 = scalar_lea.vmem (!%p242_p9), %s1175_s9, 4096 }
  0x15   : > { %s1481_s17 = smov (!%p274_p10, %s951_s17), 47  ;;  %1058 = vmatprep.subr.bf16.mxu1 %v1162_v6  ;;  %1082 = vmatprep.subr.bf16.mxu0 %v1166_v18 }
  0x16   : > { %s952_s20 = sshll.u32 %s1481_s17, 2 }
  0x17   : > { %s277_s23 = scalar_lea.vmem %s1466_s0, %s952_s20  ;;  %s884_s20 = sshll.u32 %s1396_s18, 4  ;;  %s1418_s20 = int_to_ptr.vmem [resolvable:$true] %s884_s20 }
  0x18   : > { %v1154_v7 = vld [vmem:[%s277_s23] sm:$0xff]   ;;  %v1155_v8 = vld [vmem:[%s277_s23 + $0x8] sm:$0xff]   ;;  %v1156_v9 = vld [vmem:[%s277_s23 + $0x10] sm:$0xff]   ;;  %s1170_s29 = scalar_lea.vmem %s1418_s20, 2048  ;;  %p1177_p0 = scmp.lt.s32.totalorder %s1418_s20, %s1175_s9 }
  0x19   : > { %1042 = vmatprep.mubr.msk.bf16.mxu0 %vm356_vm2, %v1154_v7  ;;  %v1158_v11 = vld [vmem:[%s277_s23 + $0x20] sm:$0xff]   ;;  %v1159_v12 = vld [vmem:[%s277_s23 + $0x28] sm:$0xff]   ;;  %v1160_v13 = vld [vmem:[%s277_s23 + $0x30] sm:$0xff]   ;;  %p1171_p11 = scmp.ne.s32.totalorder %s1418_s20, %s1170_s29  ;;  %p1178_p1 = scmp.lt.s32.totalorder %s1176_s13, %s1170_s29 }
  0x1a   : > { %1043 = vmatmul.mubr.msk.bf16.vlgmr.msra.gmra.mrb[0].mxu0 %vm356_vm2, %v1155_v8  ;;  %1050 = vmatprep.mubr.msk.bf16.mxu1 %vm356_vm2, %v1158_v11  ;;  %v1157_v14 = vld [vmem:[%s277_s23 + $0x18] sm:$0xff]  }
  0x1b   : > { %1046 = vmatprep.mubr.msk.bf16.mxu0 %vm356_vm2, %v1156_v9  ;;  %1051 = vmatmul.mubr.msk.bf16.vlgmr.msra.gmra.mrb[0].mxu1 %vm356_vm2, %v1159_v12  ;;  %v1161_v15 = vld [vmem:[%s277_s23 + $0x38] sm:$0xff]   ;;  %s1416_s23 = scalar_lea.hbm %s1473_s7, %s1003_s19  ;;  %p1172_p12 = pnand %p1171_p11, %p1316_p5 }
  0x1c   : > { %1054 = vmatprep.mubr.msk.bf16.mxu1 %vm356_vm2, %v1160_v13  ;;  %1059 = vmatpush3.bf16.msra.mxu1 %v1162_v6  ;;  %v1168_v13 = vld [vmem:[%s1471_s5 + $0x10] sm:$0xff]   ;;  %p1179_p2 = por %p1178_p1, %p1177_p0 }
  0x1d   : > { %1060 = vmatprep.subr.bf16.mxu1 %v1163_v10  ;;  %1083 = vmatpush3.bf16.msra.mxu0 %v1166_v18  ;;  %p1173_p13 = pneg %p1172_p12 }
  0x1e   : > { %1084 = vmatprep.subr.bf16.mxu0 %v1167_v19 }
  0x1f   : > { %p1180_p3 = pnand %p1179_p2, %p1173_p13 }
  0x20   : > { %1061 = vmatpush3.bf16.msra.mxu1 %v1163_v10 }
  0x21   : > { %1062 = vmatprep.subr.bf16.mxu1 %v1164_v16  ;;  %1085 = vmatpush3.bf16.msra.mxu0 %v1167_v19 }
  0x22   : > { %1047 = vmatmul.mubr.msk.bf16.gmra.mrb[4].mxu0 %vm356_vm2, %v1157_v14  ;;  %1086 = vmatprep.subr.bf16.mxu0 %v1168_v13  ;;  %v1169_v14 = vld [vmem:[%s1471_s5 + $0x18] sm:$0xff]  }
  0x23   : > { %1055 = vmatmul.mubr.msk.bf16.gmra.mrb[4].mxu1 %vm356_vm2, %v1161_v15  ;;  %v972_v15 = vld [vmem:[%s1470_s4] ss:$0 sm:$0xff] }
  0x24   : > { %1063 = vmatpush3.bf16.msra.mxu1 %v1164_v16 }
  0x25   : > { %1064 = vmatprep.subr.bf16.mxu1 %v1165_v17  ;;  %1087 = vmatpush3.bf16.msra.mxu0 %v1168_v13 }
  0x26   : > { %1088 = vmatprep.subr.bf16.mxu0 %v1169_v14 }
  0x28   : > { %1065 = vmatpush3.bf16.msra.mxu1 %v1165_v17 }
  0x29   : > { %1089 = vmatpush3.bf16.msra.mxu0 %v1169_v14 }
  0xed   : > { %v1044_v21 = vpop.f32.mrb[0].mxu0 }
  0xee   : > { %v431_v22 = vadd.f32 %v1044_v21, %v953_v20  ;;  %v422_v23 = vpop.f32.mrb[1].mxu0  ;;  %v1052_v29 = vpop.f32.mrb[0].mxu1 }
  0xef   : > { %v423_v24 = vadd.f32 %v953_v20, %v422_v23  ;;  %v1045_v25 = vpop.f32.mrb[2].mxu0  ;;  %v463_v32 = vadd.f32 %v1052_v29, %v953_v20  ;;  %v454_v33 = vpop.f32.mrb[1].mxu1 }
  0xf0   : > { %v434_v26 = vadd.f32 %v1045_v25, %v953_v20  ;;  %v425_v27 = vpop.f32.mrb[3].mxu0  ;;  %v487_v30 = vmax.f32 %v431_v22, 0.0  ;;  %v455_v36 = vadd.f32 %v953_v20, %v454_v33  ;;  %v1053_v37 = vpop.f32.mrb[2].mxu1 }
  0xf1   : > { %v426_v28 = vadd.f32 %v953_v20, %v425_v27  ;;  %v485_v34 = vmax.f32 %v423_v24, 0.0  ;;  %v495_v39 = vmax.f32 %v463_v32, 0.0  ;;  %v466_v40 = vadd.f32 %v1053_v37, %v953_v20  ;;  %v457_v41 = vpop.f32.mrb[3].mxu1 }
  0xf2   : > { %v488_v31 = vmax.f32 %v434_v26, 0.0  ;;  %v493_v44 = vmax.f32 %v455_v36, 0.0  ;;  %v458_v45 = vadd.f32 %v953_v20, %v457_v41 }
  0xf3   : > { %v486_v35 = vmax.f32 %v426_v28, 0.0  ;;  %v496_v48 = vmax.f32 %v466_v40, 0.0 }
  0xf4   : > { %v502_v38 = vpack.c.bf16 %v488_v31, %v487_v30  ;;  %v494_v51 = vmax.f32 %v458_v45, 0.0 }
  0xf5   : > { %v501_v42 = vpack.c.bf16 %v486_v35, %v485_v34  ;;  %v1048_v43 = vpop.f32.mrb[4].mxu0  ;;  %v506_v54 = vpack.c.bf16 %v496_v48, %v495_v39 }
  0xf6   : > { %v447_v46 = vadd.f32 %v1048_v43, %v953_v20  ;;  %v438_v47 = vpop.f32.mrb[5].mxu0  ;;  %v505_v56 = vpack.c.bf16 %v494_v51, %v493_v44  ;;  %v1056_v57 = vpop.f32.mrb[4].mxu1 }
  0xf7   : > { %v439_v49 = vadd.f32 %v953_v20, %v438_v47  ;;  %v1049_v50 = vpop.f32.mrb[6].mxu0  ;;  %1066 = vmatprep.mubr.msk.bf16.mxu1 %vm548_vm3, %v501_v42  ;;  %v479_v60 = vadd.f32 %v1056_v57, %v953_v20  ;;  %v470_v61 = vpop.f32.mrb[5].mxu1 }
  0xf8   : > { %v450_v52 = vadd.f32 %v1049_v50, %v953_v20  ;;  %v441_v53 = vpop.f32.mrb[7].mxu0  ;;  %1067 = vmatmul.mubr.msk.bf16.vlgmr.msra.gmra.mrb[8].mxu1 %vm548_vm3, %v502_v38  ;;  %v491_v58 = vmax.f32 %v447_v46, 0.0  ;;  %v471_v0 = vadd.f32 %v953_v20, %v470_v61  ;;  %v1057_v1 = vpop.f32.mrb[6].mxu1 }
  0xf9   : > { %v442_v55 = vadd.f32 %v953_v20, %v441_v53  ;;  %v489_v62 = vmax.f32 %v439_v49, 0.0  ;;  %v499_v3 = vmax.f32 %v479_v60, 0.0  ;;  %v482_v4 = vadd.f32 %v1057_v1, %v953_v20  ;;  %v473_v5 = vpop.f32.mrb[7].mxu1 }
  0xfa   : > { %v492_v59 = vmax.f32 %v450_v52, 0.0  ;;  %v497_v7 = vmax.f32 %v471_v0, 0.0  ;;  %v474_v8 = vadd.f32 %v953_v20, %v473_v5 }
  0xfb   : > { %v490_v63 = vmax.f32 %v442_v55, 0.0  ;;  %v500_v9 = vmax.f32 %v482_v4, 0.0 }
  0xfc   : > { %v504_v2 = vpack.c.bf16 %v492_v59, %v491_v58  ;;  %v498_v10 = vmax.f32 %v474_v8, 0.0  ;;  %v985_v8 = vld [vmem:[%s1472_s6] ss:$0 sm:$0xff] }
  0xfd   : > { %v503_v6 = vpack.c.bf16 %v490_v63, %v489_v62  ;;  %v508_v11 = vpack.c.bf16 %v500_v9, %v499_v3 }
  0xfe   : > { %v507_v12 = vpack.c.bf16 %v498_v10, %v497_v7 }
  0xff   : > { %1070 = vmatprep.mubr.msk.bf16.mxu1 %vm548_vm3, %v503_v6 }
 0x100   : > { %1071 = vmatmul.mubr.msk.bf16.gmra.mrb[12].mxu1 %vm548_vm3, %v504_v2 }
 0x101   : > { %1074 = vmatprep.mubr.msk.bf16.mxu1 %vm548_vm3, %v505_v56 }
 0x108   : > { %1075 = vmatmul.mubr.msk.bf16.gmra.mrb[16].mxu1 %vm548_vm3, %v506_v54 }
 0x109   : > { %1078 = vmatprep.mubr.msk.bf16.mxu1 %vm548_vm3, %v507_v12 }
 0x110   : > { %1079 = vmatmul.mubr.msk.bf16.gmra.mrb[20].mxu1 %vm548_vm3, %v508_v11 }
 0x1cb   : > { %v1068_v16 = vpop.f32.mrb[8].mxu1 }
 0x1cc   : > { %v616_v17 = vadd.f32 %v1068_v16, %v972_v15  ;;  %v607_v18 = vpop.f32.mrb[9].mxu1 }
 0x1cd   : > { %v608_v19 = vadd.f32 %v972_v15, %v607_v18  ;;  %v1069_v20 = vpop.f32.mrb[10].mxu1 }
 0x1ce   : > { %v619_v21 = vadd.f32 %v1069_v20, %v972_v15  ;;  %v610_v22 = vpop.f32.mrb[11].mxu1  ;;  %v672_v24 = vmax.f32 %v616_v17, 0.0 }
 0x1cf   : > { %v611_v23 = vadd.f32 %v972_v15, %v610_v22  ;;  %v670_v26 = vmax.f32 %v608_v19, 0.0 }
 0x1d0   : > { %v673_v25 = vmax.f32 %v619_v21, 0.0 }
 0x1d1   : > { %v671_v27 = vmax.f32 %v611_v23, 0.0 }
 0x1d2   : > { %v687_v28 = vpack.c.bf16 %v673_v25, %v672_v24 }
 0x1d3   : > { %v686_v29 = vpack.c.bf16 %v671_v27, %v670_v26  ;;  %v1072_v30 = vpop.f32.mrb[12].mxu1 }
 0x1d4   : > { %v632_v31 = vadd.f32 %v1072_v30, %v972_v15  ;;  %v623_v32 = vpop.f32.mrb[13].mxu1 }
 0x1d5   : > { %v624_v33 = vadd.f32 %v972_v15, %v623_v32  ;;  %v1073_v34 = vpop.f32.mrb[14].mxu1  ;;  %1090 = vmatprep.mubr.msk.bf16.mxu0 %vm548_vm3, %v686_v29 }
 0x1d6   : > { %v635_v35 = vadd.f32 %v1073_v34, %v972_v15  ;;  %v626_v36 = vpop.f32.mrb[15].mxu1  ;;  %1091 = vmatmul.mubr.msk.bf16.vlgmr.msra.gmra.mrb[8].mxu0 %vm548_vm3, %v687_v28  ;;  %v676_v38 = vmax.f32 %v632_v31, 0.0 }
 0x1d7   : > { %v627_v37 = vadd.f32 %v972_v15, %v626_v36  ;;  %v674_v40 = vmax.f32 %v624_v33, 0.0 }
 0x1d8   : > { %v677_v39 = vmax.f32 %v635_v35, 0.0 }
 0x1d9   : > { %v675_v41 = vmax.f32 %v627_v37, 0.0 }
 0x1da   : > { %v689_v42 = vpack.c.bf16 %v677_v39, %v676_v38 }
 0x1db   : > { %v688_v43 = vpack.c.bf16 %v675_v41, %v674_v40  ;;  %v1076_v44 = vpop.f32.mrb[16].mxu1 }
 0x1dc   : > { %v648_v45 = vadd.f32 %v1076_v44, %v972_v15  ;;  %v639_v46 = vpop.f32.mrb[17].mxu1 }
 0x1dd   : > { %v640_v47 = vadd.f32 %v972_v15, %v639_v46  ;;  %v1077_v48 = vpop.f32.mrb[18].mxu1  ;;  %1094 = vmatprep.mubr.msk.bf16.mxu0 %vm548_vm3, %v688_v43 }
 0x1de   : > { %v651_v49 = vadd.f32 %v1077_v48, %v972_v15  ;;  %v642_v50 = vpop.f32.mrb[19].mxu1  ;;  %1095 = vmatmul.mubr.msk.bf16.gmra.mrb[12].mxu0 %vm548_vm3, %v689_v42  ;;  %v680_v52 = vmax.f32 %v648_v45, 0.0 }
 0x1df   : > { %v643_v51 = vadd.f32 %v972_v15, %v642_v50  ;;  %v678_v54 = vmax.f32 %v640_v47, 0.0 }
 0x1e0   : > { %v681_v53 = vmax.f32 %v651_v49, 0.0 }
 0x1e1   : > { %v679_v55 = vmax.f32 %v643_v51, 0.0 }
 0x1e2   : > { %v691_v56 = vpack.c.bf16 %v681_v53, %v680_v52 }
 0x1e3   : > { %v690_v57 = vpack.c.bf16 %v679_v55, %v678_v54  ;;  %v1080_v58 = vpop.f32.mrb[20].mxu1 }
 0x1e4   : > { %v664_v59 = vadd.f32 %v1080_v58, %v972_v15  ;;  %v655_v60 = vpop.f32.mrb[21].mxu1 }
 0x1e5   : > { %v656_v61 = vadd.f32 %v972_v15, %v655_v60  ;;  %v1081_v62 = vpop.f32.mrb[22].mxu1  ;;  %1098 = vmatprep.mubr.msk.bf16.mxu0 %vm548_vm3, %v690_v57 }
 0x1e6   : > { %v667_v63 = vadd.f32 %v1081_v62, %v972_v15  ;;  %v658_v0 = vpop.f32.mrb[23].mxu1  ;;  %1099 = vmatmul.mubr.msk.bf16.gmra.mrb[16].mxu0 %vm548_vm3, %v691_v56  ;;  %v684_v2 = vmax.f32 %v664_v59, 0.0 }
 0x1e7   : > { %v659_v1 = vadd.f32 %v972_v15, %v658_v0  ;;  %v682_v4 = vmax.f32 %v656_v61, 0.0 }
 0x1e8   : > { %v685_v3 = vmax.f32 %v667_v63, 0.0 }
 0x1e9   : > { %v683_v5 = vmax.f32 %v659_v1, 0.0 }
 0x1ea   : > { %v693_v6 = vpack.c.bf16 %v685_v3, %v684_v2 }
 0x1eb   : > { %v692_v7 = vpack.c.bf16 %v683_v5, %v682_v4 }
 0x1ed   : > { %1102 = vmatprep.mubr.msk.bf16.mxu0 %vm548_vm3, %v692_v7 }
 0x1ee   : > { %1103 = vmatmul.mubr.msk.bf16.gmra.mrb[20].mxu0 %vm548_vm3, %v693_v6 }
 0x2a9   : > { %v1092_v9 = vpop.f32.mrb[8].mxu0 }
 0x2aa   : > { %v800_v10 = vadd.f32 %v1092_v9, %v985_v8  ;;  %v791_v11 = vpop.f32.mrb[9].mxu0 }
 0x2ab   : > { %v792_v12 = vadd.f32 %v985_v8, %v791_v11  ;;  %v1093_v13 = vpop.f32.mrb[10].mxu0 }
 0x2ac   : > { %856 = vst [vmem:[%s1396_s18 + $0x10] sm:$0xff] %v800_v10  ;;  %v803_v14 = vadd.f32 %v1093_v13, %v985_v8  ;;  %v794_v15 = vpop.f32.mrb[11].mxu0 }
 0x2ad   : > { %854 = vst [vmem:[%s1396_s18] sm:$0xff] %v792_v12  ;;  %v795_v16 = vadd.f32 %v985_v8, %v794_v15 }
 0x2ae   : > { %857 = vst [vmem:[%s1396_s18 + $0x18] sm:$0xff] %v803_v14 }
 0x2af   : > { %855 = vst [vmem:[%s1396_s18 + $0x8] sm:$0xff] %v795_v16 }
 0x2b1   : > { %v1096_v17 = vpop.f32.mrb[12].mxu0 }
 0x2b2   : > { %v816_v18 = vadd.f32 %v1096_v17, %v985_v8  ;;  %v807_v19 = vpop.f32.mrb[13].mxu0 }
 0x2b3   : > { %v808_v20 = vadd.f32 %v985_v8, %v807_v19  ;;  %v1097_v21 = vpop.f32.mrb[14].mxu0 }
 0x2b4   : > { %860 = vst [vmem:[%s1396_s18 + $0x30] sm:$0xff] %v816_v18  ;;  %v819_v22 = vadd.f32 %v1097_v21, %v985_v8  ;;  %v810_v23 = vpop.f32.mrb[15].mxu0 }
 0x2b5   : > { %858 = vst [vmem:[%s1396_s18 + $0x20] sm:$0xff] %v808_v20  ;;  %v811_v24 = vadd.f32 %v985_v8, %v810_v23 }
 0x2b6   : > { %861 = vst [vmem:[%s1396_s18 + $0x38] sm:$0xff] %v819_v22 }
 0x2b7   : > { %859 = vst [vmem:[%s1396_s18 + $0x28] sm:$0xff] %v811_v24 }
 0x2b9   : > { %v1100_v25 = vpop.f32.mrb[16].mxu0 }
 0x2ba   : > { %v832_v26 = vadd.f32 %v1100_v25, %v985_v8  ;;  %v823_v27 = vpop.f32.mrb[17].mxu0 }
 0x2bb   : > { %v824_v28 = vadd.f32 %v985_v8, %v823_v27  ;;  %v1101_v29 = vpop.f32.mrb[18].mxu0 }
 0x2bc   : > { %864 = vst [vmem:[%s1396_s18 + $0x50] sm:$0xff] %v832_v26  ;;  %v835_v30 = vadd.f32 %v1101_v29, %v985_v8  ;;  %v826_v31 = vpop.f32.mrb[19].mxu0 }
 0x2bd   : > { %862 = vst [vmem:[%s1396_s18 + $0x40] sm:$0xff] %v824_v28  ;;  %v827_v32 = vadd.f32 %v985_v8, %v826_v31 }
 0x2be   : > { %865 = vst [vmem:[%s1396_s18 + $0x58] sm:$0xff] %v835_v30 }
 0x2bf   : > { %863 = vst [vmem:[%s1396_s18 + $0x48] sm:$0xff] %v827_v32 }
 0x2c1   : > { %v1104_v33 = vpop.f32.mrb[20].mxu0 }
 0x2c2   : > { %v848_v34 = vadd.f32 %v1104_v33, %v985_v8  ;;  %v839_v35 = vpop.f32.mrb[21].mxu0 }
 0x2c3   : > { %v840_v36 = vadd.f32 %v985_v8, %v839_v35  ;;  %v1105_v37 = vpop.f32.mrb[22].mxu0 }
 0x2c4   : > { %868 = vst [vmem:[%s1396_s18 + $0x70] sm:$0xff] %v848_v34  ;;  %v851_v38 = vadd.f32 %v1105_v37, %v985_v8  ;;  %v842_v39 = vpop.f32.mrb[23].mxu0 }
 0x2c5   : > { %866 = vst [vmem:[%s1396_s18 + $0x60] sm:$0xff] %v840_v36  ;;  %v843_v40 = vadd.f32 %v985_v8, %v842_v39 }
 0x2c6   : > { %869 = vst [vmem:[%s1396_s18 + $0x78] sm:$0xff] %v851_v38 }
 0x2c7   : > { %867 = vst [vmem:[%s1396_s18 + $0x68] sm:$0xff] %v843_v40 }
 0x2c8   : > { %1183 = shalt.err (!%p1180_p3)
}
 0x2c9   : > { %s1184_s14 = scalar_lea.hbm %s1416_s23, 2048  ;;  %s1188_s17 = scalar_lea.hbm %s1473_s7, 6144 }
 0x2ca   : > { %p1185_p4 = scmp.ne.s32.totalorder %s1416_s23, %s1184_s14  ;;  %p1189_p9 = scmp.lt.u32.totalorder %s1416_s23, %s1473_s7 }
 0x2cb   : > { %p1190_p10 = scmp.lt.u32.totalorder %s1188_s17, %s1184_s14  ;;  %p1192_p12 = scmp.lt.u32.totalorder %s1184_s14, %s1416_s23 }
 0x2cc   : > { %p1186_p7 = pnand %p1185_p4, %p1316_p5 }
 0x2cd   : > { %p1191_p11 = por %p1190_p10, %p1189_p9 }
 0x2ce   : > { %p1187_p8 = pneg %p1186_p7 }
 0x2cf   : > { %p1193_p13 = por %p1192_p12, %p1191_p11 }
 0x2d1   : > { %p1194_p0 = pnand %p1193_p13, %p1187_p8 }
 0x2d3   : > { %1197 = shalt.err (!%p1194_p0)
}
 0x2d4   : > { %s1236_s21 = smov 128   ;;  %s1237_s22 = smov 8  }
 0x2d5   : > { %1110 = dma.vmem_to_hbm [thread:$0]  (%p1316_p5), %s1418_s20, 2048, %s1416_s23, %s1425_s28, %s1236_s21, %s1236_s21, %s1237_s22  }
 0x2d6 PF: > { %p1116_p1 = scmp.ge.s32.totalorder %s1232_s27, 2  ;;  %s899_s29 = sand.u32 1, %s1220_s24  }
 0x2d7   : > { %s900_s8 = scalar_lea.sflag [#allocation3], %s899_s29 }
 0x2d8   : > { %p1113_p2 = pnand %p1116_p1, %p1320_p6 }
 0x2da   : > { %1215 = dma.done.wait (!%p1113_p2), %s900_s8, 2048  }
 0x2db   : > { %1217 = vsyncadd (!%p1113_p2), %s900_s8, 4294965248  ;;  %p17_p3 = scmp.ge.s32.totalorder %s1303_s30, 5   ;;  %s1476_s24 = smov %s1224_s25 }
 0x2dc   : > { %s1477_s25 = smov %s1228_s26  ;;  %s1478_s26 = smov %s1314_s10 }
 0x2dd   : > { %s1479_s27 = smov %s1303_s30  ;;  %19 = sbr.rel (!%p17_p3) target bundleno = 3 (0x3), region = 83 }
 0x2e4   :  { %905 = vsyncpa [#allocation3], 1 }
 0x2e5   :  { %907 = vsyncpa [#allocation3 + $0x1], 1 }

</bundles_post_ra>
